<compile_context>
chip_gen: v7x
topology: tpu7x:2x2x1
jax: 0.10.0
libtpu: 0.0.40
codegen_flags: <defaults>
</compile_context>

<pallas_src>
import jax
import jax.numpy as jnp
from jax.experimental import pallas as pl
from jax.experimental.pallas import tpu as pltpu

_LANE = 128
_SUBLANE = 8


def _round_up(a, m):
    return (a + m - 1) // m * m


def _pad2d(a, rows, cols):
    r, c = a.shape
    if r == rows and c == cols:
        return a
    return jnp.zeros((rows, cols), a.dtype).at[:r, :c].set(a)


def vnet_kernel(x_ref, w1_ref, b1_ref, w2_ref, b2_ref, o_ref, h_ref):
    # x_ref : (bm, in_p)    bf16/f32 batch tile
    # w1_ref: (in_p, h_p)   full weight, resident across the grid
    # b1_ref: (1, h_p)      f32
    # w2_ref: (h_p, out_p)  full weight
    # b2_ref: (1, out_p)    f32
    # o_ref : (bm, out_p)   lane-dense output tile
    # h_ref : (bm, h_p)     f32 VMEM scratch for the hidden activations
    # First linear on the MXU, f32 accumulation; bias + ReLU on the VPU.
    h = jnp.dot(x_ref[...], w1_ref[...], preferred_element_type=jnp.float32)
    h_ref[...] = jnp.maximum(h + b1_ref[...], 0.0)
    # Second linear: out_p is a multiple of 128, so this uses full MXU columns.
    y = jnp.dot(h_ref[...].astype(w2_ref.dtype), w2_ref[...],
                preferred_element_type=jnp.float32)
    y = y + b2_ref[...]
    # Sigmoid on the EUP (kept in f32), lane-dense store.
    o_ref[...] = jax.nn.sigmoid(y).astype(o_ref.dtype)


def vnet_forward(x, w1, b1, w2, b2, *, bm=None, compute_dtype=jnp.bfloat16):
    """x: (N, in_dim). Returns sigmoid(relu(x @ w1 + b1) @ w2 + b2)."""
    N, in_dim = x.shape
    h_dim = w1.shape[1]
    out_dim = w2.shape[1]

    # Pad feature dims to lane width (128); zero padding is exact for this
    # network (padded h columns are relu(0) = 0 and hit zero rows of W2).
    in_p = _round_up(in_dim, _LANE)
    h_p = _round_up(h_dim, _LANE)
    out_p = _round_up(out_dim, _LANE)

    itm_c = jnp.dtype(compute_dtype).itemsize
    itm_o = jnp.dtype(x.dtype).itemsize

    # --- Row-tile selection -------------------------------------------------
    if bm is None:
        n8 = _round_up(max(N, _SUBLANE), _SUBLANE)
        bm = min(512, n8)
        # Keep >= 2 meaningful grid steps for the two v7x TensorCores.
        if n8 // bm < 2 and n8 >= 256:
            bm = _round_up(n8 // 2, _SUBLANE)
        # Respect VMEM (double-buffered x/out tiles + f32 hidden scratch).
        def _tile_bytes(b):
            return 2 * b * in_p * itm_c + 2 * b * out_p * itm_o + b * h_p * 4
        while bm > _SUBLANE and _tile_bytes(bm) > (16 << 20):
            bm = _round_up(bm // 2, _SUBLANE)
    N_p = _round_up(max(N, bm), bm)

    # --- Pad / cast operands ------------------------------------------------
    xp = _pad2d(x, N_p, in_p).astype(compute_dtype)
    w1p = _pad2d(w1, in_p, h_p).astype(compute_dtype)
    w2p = _pad2d(w2, h_p, out_p).astype(compute_dtype)
    b1p = _pad2d(b1.reshape(1, h_dim).astype(jnp.float32), 1, h_p)
    b2p = _pad2d(b2.reshape(1, out_dim).astype(jnp.float32), 1, out_p)

    # --- VMEM budget / cost hints --------------------------------------------
    tile_bytes = 2 * bm * in_p * itm_c + 2 * bm * out_p * itm_o + bm * h_p * 4
    weight_bytes = 2 * (in_p * h_p + h_p * out_p) * itm_c + 2 * (h_p + out_p) * 4
    vmem_limit = int(tile_bytes + weight_bytes + (4 << 20))

    flops = 2 * N_p * (in_p * h_p + h_p * out_p)
    bytes_accessed = (xp.size * itm_c + w1p.size * itm_c + w2p.size * itm_c
                      + b1p.size * 4 + b2p.size * 4 + N_p * out_p * itm_o)
    cost = pl.CostEstimate(flops=flops,
                           transcendentals=N_p * out_p,
                           bytes_accessed=bytes_accessed)

    grid = (N_p // bm,)
    out_padded = pl.pallas_call(
        vnet_kernel,
        out_shape=jax.ShapeDtypeStruct((N_p, out_p), x.dtype),
        grid_spec=pl.GridSpec(
            grid=grid,
            in_specs=[
                pl.BlockSpec((bm, in_p), lambda i: (i, 0)),     # x tile
                pl.BlockSpec((in_p, h_p), lambda i: (0, 0)),    # W1 (full)
                pl.BlockSpec((1, h_p), lambda i: (0, 0)),       # b1
                pl.BlockSpec((h_p, out_p), lambda i: (0, 0)),   # W2 (full)
                pl.BlockSpec((1, out_p), lambda i: (0, 0)),     # b2
            ],
            out_specs=pl.BlockSpec((bm, out_p), lambda i: (i, 0)),
            scratch_shapes=[pltpu.VMEM((bm, h_p), jnp.float32)],
        ),
        compiler_params=pltpu.CompilerParams(
            dimension_semantics=("parallel",),
            vmem_limit_bytes=vmem_limit),
        cost_estimate=cost,
    )(xp, w1p, b1p, w2p, b2p)

    # Slice away row/column padding.
    return out_padded[:N, :out_dim]


def init_params(key, in_dim, h_dim, out_dim, dtype=jnp.float32):
    """Deterministic init mimicking nn.Linear default (uniform +-1/sqrt(fan_in))."""
    k1, k2, k3, k4 = jax.random.split(key, 4)
    lim1 = 1.0 / (in_dim ** 0.5)
    lim2 = 1.0 / (h_dim ** 0.5)
    # stored pre-transposed: (in_dim, h_dim), (h_dim, out_dim)
    w1 = jax.random.uniform(k1, (in_dim, h_dim), dtype, -lim1, lim1)
    b1 = jax.random.uniform(k2, (h_dim,), dtype, -lim1, lim1)
    w2 = jax.random.uniform(k3, (h_dim, out_dim), dtype, -lim2, lim2)
    b2 = jax.random.uniform(k4, (out_dim,), dtype, -lim2, lim2)
    return w1, b1, w2, b2


if __name__ == "__main__":
    key = jax.random.PRNGKey(0)
    kx, kp = jax.random.split(key)

    N, in_dim, h_dim, out_dim = 16, 32, 64, 1
    x = jax.random.normal(kx, (N, in_dim), jnp.float32)
    w1, b1, w2, b2 = init_params(kp, in_dim, h_dim, out_dim)

    out = vnet_forward(x, w1, b1, w2, b2)
    out = jax.block_until_ready(out)

    # Reference check in plain JAX (f32); kernel matmuls run in bf16 with f32
    # accumulation, so use a correspondingly loose tolerance.
    ref = jax.nn.sigmoid(jnp.maximum(x @ w1 + b1, 0.0) @ w2 + b2)
    assert out.shape == (N, out_dim)
    assert jnp.allclose(out, ref, atol=2e-2, rtol=2e-2), \
        float(jnp.max(jnp.abs(out - ref)))

    print("KERNEL_OK")
</pallas_src>

<mosaic_0001>
module attributes {stable_mosaic.version = 11 : i64} {
  func.func @vnet_kernel(%arg0: i32, %arg1: memref<16x128xbf16, #tpu.memory_space<vmem>>, %arg2: memref<128x128xbf16, #tpu.memory_space<vmem>>, %arg3: memref<1x128xf32, #tpu.memory_space<vmem>>, %arg4: memref<128x128xbf16, #tpu.memory_space<vmem>>, %arg5: memref<1x128xf32, #tpu.memory_space<vmem>>, %arg6: memref<16x128xf32, #tpu.memory_space<vmem>>, %arg7: memref<16x128xf32, #tpu.memory_space<vmem>>) attributes {dimension_semantics = [#tpu.dimension_semantics<parallel>], iteration_bounds = array<i64: 1>, scalar_prefetch = 0 : i64, scratch_operands = 1 : i64, tpu.core_type = #tpu.core_type<tc>, window_params = [{transform_indices = @transform_0, window_bounds = array<i64: 16, 128>}, {pipeline_mode = #tpu.pipeline_mode<synchronous>, transform_indices = @transform_1, window_bounds = array<i64: 128, 128>}, {pipeline_mode = #tpu.pipeline_mode<synchronous>, transform_indices = @transform_2, window_bounds = array<i64: 1, 128>}, {pipeline_mode = #tpu.pipeline_mode<synchronous>, transform_indices = @transform_3, window_bounds = array<i64: 128, 128>}, {pipeline_mode = #tpu.pipeline_mode<synchronous>, transform_indices = @transform_4, window_bounds = array<i64: 1, 128>}, {transform_indices = @transform_5, window_bounds = array<i64: 16, 128>}]} {
    %c0 = arith.constant 0 : index
    %c0_0 = arith.constant 0 : index
    %0 = vector.load %arg1[%c0, %c0_0] : memref<16x128xbf16, #tpu.memory_space<vmem>>, vector<16x128xbf16>
    %c0_1 = arith.constant 0 : index
    %c0_2 = arith.constant 0 : index
    %1 = vector.load %arg2[%c0_1, %c0_2] : memref<128x128xbf16, #tpu.memory_space<vmem>>, vector<128x128xbf16>
    %cst = arith.constant dense<0.000000e+00> : vector<16x128xf32>
    %2 = tpu.matmul %0, %1, %cst {dimension_numbers = #tpu.dot_dimension_numbers<[1], [0], [0], [1], [0, 0, 1, 1], [], []>} : vector<16x128xbf16>, vector<128x128xbf16>, vector<16x128xf32> -> vector<16x128xf32>
    %c0_3 = arith.constant 0 : index
    %c0_4 = arith.constant 0 : index
    %3 = vector.load %arg3[%c0_3, %c0_4] : memref<1x128xf32, #tpu.memory_space<vmem>>, vector<1x128xf32>
    %4 = vector.broadcast %3 : vector<1x128xf32> to vector<16x128xf32>
    %5 = arith.addf %2, %4 : vector<16x128xf32>
    %cst_5 = arith.constant 0.000000e+00 : f32
    %6 = vector.broadcast %cst_5 : f32 to vector<16x128xf32>
    %7 = arith.maximumf %5, %6 : vector<16x128xf32>
    %c0_6 = arith.constant 0 : index
    %c0_7 = arith.constant 0 : index
    %8 = vector.load %arg7[%c0_6, %c0_7] : memref<16x128xf32, #tpu.memory_space<vmem>>, vector<16x128xf32>
    tpu.vector_store %arg7[%c0_6, %c0_7], %7 {strides = array<i32>} : memref<16x128xf32, #tpu.memory_space<vmem>>, vector<16x128xf32>,
    %c0_8 = arith.constant 0 : index
    %c0_9 = arith.constant 0 : index
    %9 = vector.load %arg7[%c0_8, %c0_9] : memref<16x128xf32, #tpu.memory_space<vmem>>, vector<16x128xf32>
    %10 = arith.truncf %9 : vector<16x128xf32> to vector<16x128xbf16>
    %c0_10 = arith.constant 0 : index
    %c0_11 = arith.constant 0 : index
    %11 = vector.load %arg4[%c0_10, %c0_11] : memref<128x128xbf16, #tpu.memory_space<vmem>>, vector<128x128xbf16>
    %cst_12 = arith.constant dense<0.000000e+00> : vector<16x128xf32>
    %12 = tpu.matmul %10, %11, %cst_12 {dimension_numbers = #tpu.dot_dimension_numbers<[1], [0], [0], [1], [0, 0, 1, 1], [], []>} : vector<16x128xbf16>, vector<128x128xbf16>, vector<16x128xf32> -> vector<16x128xf32>
    %c0_13 = arith.constant 0 : index
    %c0_14 = arith.constant 0 : index
    %13 = vector.load %arg5[%c0_13, %c0_14] : memref<1x128xf32, #tpu.memory_space<vmem>>, vector<1x128xf32>
    %14 = vector.broadcast %13 : vector<1x128xf32> to vector<16x128xf32>
    %15 = arith.addf %12, %14 : vector<16x128xf32>
    %16 = arith.negf %15 : vector<16x128xf32>
    %17 = math.exp %16 : vector<16x128xf32>
    %cst_15 = arith.constant 1.000000e+00 : f32
    %18 = vector.broadcast %cst_15 : f32 to vector<16x128xf32>
    %19 = arith.addf %18, %17 : vector<16x128xf32>
    %20 = arith.divf %18, %19 : vector<16x128xf32>
    %c0_16 = arith.constant 0 : index
    %c0_17 = arith.constant 0 : index
    %21 = vector.load %arg6[%c0_16, %c0_17] : memref<16x128xf32, #tpu.memory_space<vmem>>, vector<16x128xf32>
    tpu.vector_store %arg6[%c0_16, %c0_17], %20 {strides = array<i32>} : memref<16x128xf32, #tpu.memory_space<vmem>>, vector<16x128xf32>,
    return
  }
  func.func @transform_0(%arg0: i32) -> (i32, i32) {
    %c0_i32 = arith.constant 0 : i32
    %c0_i32_0 = arith.constant 0 : i32
    return %arg0, %c0_i32 : i32, i32
  }
  func.func @transform_1(%arg0: i32) -> (i32, i32) {
    %c0_i32 = arith.constant 0 : i32
    %c0_i32_0 = arith.constant 0 : i32
    %c0_i32_1 = arith.constant 0 : i32
    return %c0_i32, %c0_i32_0 : i32, i32
  }
  func.func @transform_2(%arg0: i32) -> (i32, i32) {
    %c0_i32 = arith.constant 0 : i32
    %c0_i32_0 = arith.constant 0 : i32
    %c0_i32_1 = arith.constant 0 : i32
    return %c0_i32, %c0_i32_0 : i32, i32
  }
  func.func @transform_3(%arg0: i32) -> (i32, i32) {
    %c0_i32 = arith.constant 0 : i32
    %c0_i32_0 = arith.constant 0 : i32
    %c0_i32_1 = arith.constant 0 : i32
    return %c0_i32, %c0_i32_0 : i32, i32
  }
  func.func @transform_4(%arg0: i32) -> (i32, i32) {
    %c0_i32 = arith.constant 0 : i32
    %c0_i32_0 = arith.constant 0 : i32
    %c0_i32_1 = arith.constant 0 : i32
    return %c0_i32, %c0_i32_0 : i32, i32
  }
  func.func @transform_5(%arg0: i32) -> (i32, i32) {
    %c0_i32 = arith.constant 0 : i32
    %c0_i32_0 = arith.constant 0 : i32
    return %arg0, %c0_i32 : i32, i32
  }
}

</mosaic_0001>

<bundles_post_ra>
// kernel: tpu_custom_call.1
= control target key start
LH: loop header
LB: loop body
LE: loop exit
PB: predicated region body
PF: predicated region fallthrough
CT: control target
= control target key end

     0   :  { %10 = vsyncpa [#allocation4], 0  ;;  %s652_s0 = inlined_call_operand.hbm [shape: bf16[16,128], index: 0, kind: input, shape index: {}]   ;;  %s653_s1 = inlined_call_operand.hbm [shape: bf16[128,128], index: 1, kind: input, shape index: {}]   ;;  %s654_s2 = inlined_call_operand.vmem [shape: f32[1,128], index: 2, kind: input, shape index: {}]   ;;  %s655_s3 = inlined_call_operand.hbm [shape: bf16[128,128], index: 3, kind: input, shape index: {}]   ;;  %s656_s4 = inlined_call_operand.vmem [shape: f32[1,128], index: 4, kind: input, shape index: {}]   ;;  %s657_s5 = inlined_call_operand.hbm [shape: f32[16,128], index: 5, kind: output, shape index: {}]  }
   0x1   :  { %11 = vsyncpa [#allocation7], 0 }
   0x2   :  { %12 = vsyncpa [#allocation5], 0  ;;  %s542_s18 = smov [#allocation6]   ;;  %s543_s20 = smov [#allocation3]  }
   0x3   :  { %s30_s19 = sshll.u32 %s542_s18, 4  ;;  %s18_s21 = sshll.u32 %s543_s20, 4  ;;  %s31_s19 = int_to_ptr.vmem [resolvable:$true] %s30_s19  ;;  %s582_s21 = int_to_ptr.vmem [resolvable:$true] %s18_s21 }
   0x4   :  { %s448_s24 = scalar_lea.hbm %s653_s1, 1024 }
   0x5   :  { %p449_p0 = scmp.ne.s32.totalorder %s653_s1, %s448_s24  ;;  %p452_p1 = scmp.lt.u32.totalorder %s448_s24, %s653_s1 }
   0x7   :  { %p454_p2 = pnand %p452_p1, %p449_p0 }
   0x9   :  { %457 = shalt.err (!%p454_p2)
}
   0xa   :  { %s458_s29 = scalar_lea.vmem %s31_s19, 1024  ;;  %p463_p4 = scmp.lt.s32.totalorder %s31_s19, %s31_s19 }
   0xb   :  { %p459_p3 = scmp.ne.s32.totalorder %s31_s19, %s458_s29  ;;  %p464_p5 = scmp.lt.s32.totalorder %s458_s29, %s458_s29 }
   0xd   :  { %p465_p6 = por %p464_p5, %p463_p4 }
   0xf   :  { %p466_p7 = pnand %p465_p6, %p459_p3 }
  0x11   :  { %469 = shalt.err (!%p466_p7)
}
  0x12   :  { %s544_s30 = smov 64   ;;  %s545_s6 = smov 4  }
  0x13   :  { %36 = dma.hbm_to_vmem [thread:$0]  %s653_s1, 1024, %s31_s19, [#allocation7], %s544_s30, %s544_s30, %s545_s6  }
  0x14   :  { %s470_s11 = scalar_lea.hbm %s652_s0, 128 }
  0x15   :  { %p471_p8 = scmp.ne.s32.totalorder %s652_s0, %s470_s11  ;;  %p474_p9 = scmp.lt.u32.totalorder %s470_s11, %s652_s0 }
  0x17   :  { %p476_p10 = pnand %p474_p9, %p471_p8 }
  0x19   :  { %479 = shalt.err (!%p476_p10)
}
  0x1a   :  { %s480_s16 = scalar_lea.vmem %s582_s21, 128  ;;  %p485_p12 = scmp.lt.s32.totalorder %s582_s21, %s582_s21 }
  0x1b   :  { %p481_p11 = scmp.ne.s32.totalorder %s582_s21, %s480_s16  ;;  %p486_p13 = scmp.lt.s32.totalorder %s480_s16, %s480_s16 }
  0x1d   :  { %p487_p0 = por %p486_p13, %p485_p12 }
  0x1f   :  { %p488_p1 = pnand %p487_p0, %p481_p11 }
  0x21   :  { %491 = shalt.err (!%p488_p1)
}
  0x22   :  { %24 = dma.hbm_to_vmem [thread:$0]  %s652_s0, 128, %s582_s21, [#allocation4], %s544_s30, %s544_s30, %s545_s6  }
  0x23   :  { %s546_s18 = smov [#allocation8]   ;;  %s492_s23 = scalar_lea.hbm %s655_s3, 1024 }
  0x24   :  { %s44_s19 = sshll.u32 %s546_s18, 4  ;;  %p493_p2 = scmp.ne.s32.totalorder %s655_s3, %s492_s23  ;;  %s45_s19 = int_to_ptr.vmem [resolvable:$true] %s44_s19 }
  0x25   :  { %p496_p3 = scmp.lt.u32.totalorder %s492_s23, %s655_s3 }
  0x27   :  { %p498_p4 = pnand %p496_p3, %p493_p2 }
  0x29   :  { %501 = shalt.err (!%p498_p4)
}
  0x2a   :  { %s502_s28 = scalar_lea.vmem %s45_s19, 1024  ;;  %p507_p6 = scmp.lt.s32.totalorder %s45_s19, %s45_s19 }
  0x2b   :  { %p503_p5 = scmp.ne.s32.totalorder %s45_s19, %s502_s28  ;;  %p508_p7 = scmp.lt.s32.totalorder %s502_s28, %s502_s28 }
  0x2d   :  { %p509_p8 = por %p508_p7, %p507_p6 }
  0x2f   :  { %p510_p9 = pnand %p509_p8, %p503_p5 }
  0x31   :  { %513 = shalt.err (!%p510_p9)
}
  0x32   :  { %50 = dma.hbm_to_vmem [thread:$0]  %s655_s3, 1024, %s45_s19, [#allocation7], %s544_s30, %s544_s30, %s545_s6  }
  0x33   :  { %536 = dma.done.wait [#allocation4], 128  }
  0x34   :  { %537 = vsyncadd [#allocation4], 4294967168 }
  0x35   :  { %538 = dma.done.wait [#allocation7], 2048  }
  0x36   :  { %539 = vsyncadd [#allocation7], 4294965248  ;;  %v547_v0 = vmov 0.0   ;;  %vm548_vm0 = vmmov 0   ;;  %v423_v1 = vld [vmem:[#allocation6] sm:$0xff]   ;;  %v424_v2 = vld [vmem:[#allocation6 + $0x8] sm:$0xff]  }
  0x37   :  { %373 = vmatprep.subr.bf16.mxu0 %v547_v0  ;;  %389 = vmatprep.mubr.msk.bf16.mxu0 %vm548_vm0, %v547_v0  ;;  %v425_v3 = vld [vmem:[#allocation6 + $0x10] sm:$0xff]   ;;  %v432_v4 = vld [vmem:[#allocation8] sm:$0xff]   ;;  %v426_v5 = vld [vmem:[#allocation6 + $0x18] sm:$0xff]  }
  0x38   :  { %393 = vmatprep.subr.bf16.mxu1 %v547_v0  ;;  %409 = vmatprep.mubr.msk.bf16.mxu1 %vm548_vm0, %v547_v0  ;;  %v433_v6 = vld [vmem:[#allocation8 + $0x8] sm:$0xff]   ;;  %v427_v7 = vld [vmem:[#allocation6 + $0x20] sm:$0xff]   ;;  %v434_v8 = vld [vmem:[#allocation8 + $0x10] sm:$0xff]  }
  0x39   :  { %374 = vmatpush3.bf16.msra.mxu0 %v423_v1  ;;  %394 = vmatpush3.bf16.msra.mxu1 %v432_v4  ;;  %v428_v9 = vld [vmem:[#allocation6 + $0x28] sm:$0xff]   ;;  %v435_v10 = vld [vmem:[#allocation8 + $0x18] sm:$0xff]   ;;  %v429_v11 = vld [vmem:[#allocation6 + $0x30] sm:$0xff]  }
  0x3a   :  { %375 = vmatprep.subr.bf16.mxu0 %v547_v0  ;;  %395 = vmatprep.subr.bf16.mxu1 %v547_v0  ;;  %v436_v12 = vld [vmem:[#allocation8 + $0x20] sm:$0xff]   ;;  %v430_v13 = vld [vmem:[#allocation6 + $0x38] sm:$0xff]   ;;  %v437_v14 = vld [vmem:[#allocation8 + $0x28] sm:$0xff]  }
  0x3b   :  { %v431_v15 = vld [vmem:[#allocation3] sm:$0xff]   ;;  %v438_v16 = vld [vmem:[#allocation8 + $0x30] sm:$0xff]  }
  0x3c   :  { %v439_v17 = vld [vmem:[#allocation8 + $0x38] sm:$0xff]  }
  0x3d   :  { %376 = vmatpush3.bf16.msra.mxu0 %v424_v2  ;;  %396 = vmatpush3.bf16.msra.mxu1 %v433_v6  ;;  %v334_v18 = vld [vmem:[%s654_s2] ss:$0 sm:$0xff]  ;;  %s549_s2 = smov [#allocation9]  }
  0x3e   :  { %377 = vmatprep.subr.bf16.mxu0 %v547_v0  ;;  %397 = vmatprep.subr.bf16.mxu1 %v547_v0  ;;  %v344_v28 = vld [vmem:[%s656_s4] ss:$0 sm:$0xff]  ;;  %s321_s7 = sshll.u32 %s549_s2, 4  ;;  %s322_s7 = int_to_ptr.vmem [resolvable:$true] %s321_s7 }
  0x3f   :  { %s514_s4 = scalar_lea.vmem %s322_s7, 256  ;;  %p519_p11 = scmp.lt.s32.totalorder %s322_s7, %s322_s7 }
  0x40   :  { %p515_p10 = scmp.ne.s32.totalorder %s322_s7, %s514_s4  ;;  %p520_p12 = scmp.lt.s32.totalorder %s514_s4, %s514_s4 }
  0x41   :  { %378 = vmatpush3.bf16.msra.mxu0 %v425_v3  ;;  %398 = vmatpush3.bf16.msra.mxu1 %v434_v8 }
  0x42   :  { %379 = vmatprep.subr.bf16.mxu0 %v547_v0  ;;  %399 = vmatprep.subr.bf16.mxu1 %v547_v0  ;;  %p521_p13 = por %p520_p12, %p519_p11 }
  0x44   :  { %p522_p0 = pnand %p521_p13, %p515_p10 }
  0x45   :  { %380 = vmatpush3.bf16.msra.mxu0 %v426_v5  ;;  %400 = vmatpush3.bf16.msra.mxu1 %v435_v10 }
  0x46   :  { %381 = vmatprep.subr.bf16.mxu0 %v547_v0  ;;  %401 = vmatprep.subr.bf16.mxu1 %v547_v0 }
  0x49   :  { %382 = vmatpush3.bf16.msra.mxu0 %v427_v7  ;;  %402 = vmatpush3.bf16.msra.mxu1 %v436_v12 }
  0x4a   :  { %383 = vmatprep.subr.bf16.mxu0 %v547_v0  ;;  %403 = vmatprep.subr.bf16.mxu1 %v547_v0 }
  0x4d   :  { %384 = vmatpush3.bf16.msra.mxu0 %v428_v9  ;;  %404 = vmatpush3.bf16.msra.mxu1 %v437_v14 }
  0x4e   :  { %385 = vmatprep.subr.bf16.mxu0 %v547_v0  ;;  %405 = vmatprep.subr.bf16.mxu1 %v547_v0 }
  0x51   :  { %386 = vmatpush3.bf16.msra.mxu0 %v429_v11  ;;  %406 = vmatpush3.bf16.msra.mxu1 %v438_v16 }
  0x52   :  { %387 = vmatprep.subr.bf16.mxu0 %v547_v0  ;;  %407 = vmatprep.subr.bf16.mxu1 %v547_v0 }
  0x55   :  { %388 = vmatpush3.bf16.msra.mxu0 %v430_v13  ;;  %408 = vmatpush3.bf16.msra.mxu1 %v439_v17 }
  0x58   :  { %390 = vmatmul.mubr.bf16.vlgmr.msra.gmra.mrb[0].mxu0 %v431_v15 }
 0x12b   :  { %v176_v19 = vpop.f32.mrb[0].mxu0 }
 0x12c   :  { %v177_v20 = vadd.f32 %v334_v18, %v176_v19  ;;  %v391_v21 = vpop.f32.mrb[1].mxu0 }
 0x12d   :  { %v179_v22 = vpop.f32.mrb[2].mxu0 }
 0x12e   :  { %v180_v23 = vadd.f32 %v334_v18, %v179_v22  ;;  %v392_v24 = vpop.f32.mrb[3].mxu0  ;;  %v183_v25 = vmax.f32 %v177_v20, 0.0 }
 0x130   :  { %v184_v26 = vmax.f32 %v180_v23, 0.0 }
 0x132   :  { %v189_v27 = vpack.c.bf16 %v184_v26, %v183_v25 }
 0x134   :  { %410 = vmatmul.mubr.bf16.vlgmr.msra.gmra.mrb[0].mxu1 %v189_v27 }
 0x207   :  { %v295_v29 = vpop.f32.mrb[0].mxu1 }
 0x208   :  { %v296_v30 = vadd.f32 %v344_v28, %v295_v29  ;;  %v411_v31 = vpop.f32.mrb[1].mxu1 }
 0x209   :  { %v298_v32 = vpop.f32.mrb[2].mxu1 }
 0x20a   :  { %v353_v33 = vmul.f32 -1.442695, %v296_v30  ;;  %v299_v34 = vadd.f32 %v344_v28, %v298_v32  ;;  %v412_v35 = vpop.f32.mrb[3].mxu1 }
 0x20c   :  { %440 = vpow2.f32 %v353_v33  ;;  %v354_v36 = vmul.f32 -1.442695, %v299_v34 }
 0x20e   :  { %442 = vpow2.f32 %v354_v36 }
 0x216   :  { %v441_v37 = vpop.eup %440 }
 0x217   :  { %v308_v38 = vadd.f32 1.0, %v441_v37 }
 0x218   :  { %v443_v39 = vpop.eup %442 }
 0x219   :  { %444 = vrcp.f32 %v308_v38  ;;  %v309_v40 = vadd.f32 1.0, %v443_v39 }
 0x21b   :  { %446 = vrcp.f32 %v309_v40 }
 0x223   :  { %v445_v41 = vpop.eup %444 }
 0x224   :  { %314 = vst [vmem:[#allocation9] sm:$0xff] %v445_v41 }
 0x225   :  { %v447_v42 = vpop.eup %446 }
 0x226   :  { %315 = vst [vmem:[#allocation9 + $0x8] sm:$0xff] %v447_v42 }
 0x227   :  { %525 = shalt.err (!%p522_p0)
}
 0x228   :  { %s526_s10 = scalar_lea.hbm %s657_s5, 256 }
 0x229   :  { %p527_p1 = scmp.ne.s32.totalorder %s657_s5, %s526_s10  ;;  %p530_p2 = scmp.lt.u32.totalorder %s526_s10, %s657_s5 }
 0x22b   :  { %p532_p3 = pnand %p530_p2, %p527_p1 }
 0x22d   :  { %535 = shalt.err (!%p532_p3)
}
 0x22e   :  { %s550_s15 = smov 128   ;;  %s551_s16 = smov 8  }
 0x22f   :  { %327 = dma.vmem_to_hbm [thread:$0]  %s322_s7, 256, %s657_s5, [#allocation5], %s550_s15, %s550_s15, %s551_s16  }
 0x230   :  { %540 = dma.done.wait [#allocation5], 256  }
 0x231   :  { %541 = vsyncadd [#allocation5], 4294967040 }
 0x232   :  { %331 = vsyncpa [#allocation4], 1 }
 0x233   :  { %332 = vsyncpa [#allocation7], 1 }
 0x234   :  { %333 = vsyncpa [#allocation5], 1 }

</bundles_post_ra>
